<compile_context>
chip_gen: v5e
topology: v5e:2x2
jax: 0.10.0
libtpu: 0.0.40
codegen_flags: <defaults>
</compile_context>

<pallas_src>
import functools

import numpy as np

import jax
import jax.numpy as jnp
from jax.experimental import pallas as pl
from jax.experimental.pallas import tpu as pltpu


# --------------------------------------------------------------------------- #
# small helpers
# --------------------------------------------------------------------------- #

_ROLL_SIGN_CACHE = {}


def _roll_sign():
    """Return s so that pltpu.roll(x, t, axis=0) == jnp.roll(x, s * t, axis=0).

    Probed once per (platform, device_kind) so a cached result can never leak
    across backends / interpret mode (previous version cached process-wide).
    """
    dev = jax.devices()[0]
    key = (dev.platform, getattr(dev, "device_kind", ""))
    sign = _ROLL_SIGN_CACHE.get(key)
    if sign is None:
        def probe(x_ref, o_ref):
            o_ref[...] = pltpu.roll(x_ref[...], 1, axis=0)

        xp = jnp.broadcast_to(jnp.arange(8, dtype=jnp.float32)[:, None], (8, 128))
        y = pl.pallas_call(
            probe, out_shape=jax.ShapeDtypeStruct((8, 128), jnp.float32))(xp)
        # jnp.roll(x, 1, axis=0)[0, 0] == 7 ; jnp.roll(x, -1, axis=0)[0, 0] == 1
        sign = 1 if int(y[0, 0]) == 7 else -1
        _ROLL_SIGN_CACHE[key] = sign
    return sign


def _default_shift_dtype():
    """bf16 MRConv loop on chips with a native bf16 VALU (v6e / v7x);
    f32 on v5e and older where the casts would cost more than they save."""
    try:
        kind = jax.devices()[0].device_kind.lower()
    except Exception:
        return jnp.float32
    if any(tag in kind for tag in ("v2", "v3", "v4", "v5")):
        return jnp.float32
    return jnp.bfloat16


def _gelu(v, approx):
    if approx:
        # tanh form -> EUP slot (VALU stays free for the MRConv loop).
        return 0.5 * v * (1.0 + jnp.tanh(0.7978845608028654 *
                                         (v + 0.044715 * v * v * v)))
    # exact torch.nn.GELU() (erf based)
    return 0.5 * v * (1.0 + jax.lax.erf(v * 0.7071067811865475))


# --------------------------------------------------------------------------- #
# kernel
# --------------------------------------------------------------------------- #

def svga_block_kernel(x_ref,
                      w1_ref, b1_ref,              # Grapher.fc1 (conv + BN folded)
                      wgx_ref, wgj_ref, bg_ref,    # MRConv4d.nn conv + BN folded, row-split
                      w2_ref, b2_ref,              # Grapher.fc2 (conv + BN folded)
                      wf1_ref, bf1_ref,            # FFN.fc1
                      wf2_ref, bf2_ref,            # FFN.fc2
                      o_ref,
                      *, H, W, C, K, roll_sign, approx_gelu, shift_dtype):
    HW = H * W
    Mt = x_ref.shape[0]                  # rows in this batch tile (Bt*H*W)
    per_image = (Mt == HW)               # static: batch_tile == 1
    bf16 = jnp.bfloat16

    def rollr(a, s):
        # circular roll of rows toward higher indices by s (jnp.roll semantics)
        return pltpu.roll(a, (roll_sign * s) % Mt, axis=0)

    x = x_ref[...]                       # (Mt, C)

    # ---- Grapher.fc1: 1x1 conv + folded BN ----
    y1 = jnp.dot(x.astype(bf16), w1_ref[...],
                 preferred_element_type=jnp.float32) + b1_ref[...]

    # ---- MRConv4d: max-relative features over H/W circular shifts of step K ----
    ys = y1.astype(shift_dtype)          # bf16 on v6e/v7x: halves XLU rotate work

    x_j = None

    def fmax(acc, d):
        return d if acc is None else jnp.maximum(acc, d)

    if H > K and not per_image:
        # tiles spanning >1 image need a wrap-fix across image boundaries
        l_idx = jax.lax.broadcasted_iota(jnp.int32, (Mt, C), 0) % HW
    for i in range(K, H, K):             # vertical (H) shifts
        if per_image:
            rolled = rollr(ys, i * W)    # flat roll already wraps inside one image
        else:
            rolled = jnp.where(l_idx >= i * W,
                               rollr(ys, i * W), rollr(ys, i * W - HW))
        x_j = fmax(x_j, ys - rolled)

    if W > K:
        # W coordinate mask, built in-kernel (no DMA'd index tensors)
        w_idx = jax.lax.broadcasted_iota(jnp.int32, (Mt, C), 0) % W
    for i in range(K, W, K):             # horizontal (W) shifts (wrap within a row)
        rolled = jnp.where(w_idx >= i, rollr(ys, i), rollr(ys, i - W))
        x_j = fmax(x_j, ys - rolled)

    # torch starts from x_j = x - x = 0, so 0 participates in the running max;
    # fold it in as a final clamp instead of materializing a zero tile.
    x_j = jnp.zeros_like(ys) if x_j is None else jnp.maximum(x_j, 0.0)

    # ---- graph-conv 1x1:  concat([y1, x_j]) @ Wg  ==  y1 @ Wg[:C] + x_j @ Wg[C:]
    # (two small-K matmuls: avoids the lane-axis concat relayout at C=32) ----
    y2 = (jnp.dot(y1.astype(bf16), wgx_ref[...], preferred_element_type=jnp.float32)
          + jnp.dot(x_j.astype(bf16), wgj_ref[...], preferred_element_type=jnp.float32)
          + bg_ref[...])
    y2 = _gelu(y2, approx_gelu)          # (Mt, 2C)

    # ---- Grapher.fc2 + residual (residual added in input precision) ----
    y3 = jnp.dot(y2.astype(bf16), w2_ref[...],
                 preferred_element_type=jnp.float32) + b2_ref[...] + x

    # ---- FFN ----
    h = _gelu(jnp.dot(y3.astype(bf16), wf1_ref[...],
                      preferred_element_type=jnp.float32) + bf1_ref[...],
              approx_gelu)               # (Mt, 4C)
    out = jnp.dot(h.astype(bf16), wf2_ref[...],
                  preferred_element_type=jnp.float32) + bf2_ref[...]

    o_ref[...] = out.astype(o_ref.dtype)


# --------------------------------------------------------------------------- #
# wrapper
# --------------------------------------------------------------------------- #

def svga_block(x, params, K, *, batch_tile=1, approx_gelu=True, shift_dtype=None):
    """x: (B, H, W, C) float NHWC; params: folded weights from make_params().

    batch_tile defaults to 1 (one image per grid step): this enables the
    Mt==HW MRConv specialization, keeps the grid at B steps (both v7x
    TensorCores usable, I/O pipelined) and keeps per-step VMEM small on every
    generation.
    """
    B, H, W, C = x.shape
    Bt = B if batch_tile is None else batch_tile
    assert B % Bt == 0, "batch_tile must divide the batch"
    M, Mt = B * H * W, Bt * H * W

    if shift_dtype is None:
        shift_dtype = _default_shift_dtype()

    x2d = x.reshape(M, C)                # free reshape; 2D layout end-to-end
    roll_sign = _roll_sign()

    def _full_spec(p):
        return pl.BlockSpec(p.shape, lambda b, _nd=p.ndim: (0,) * _nd)

    # VMEM request sized from the actual footprint, capped per generation from
    # the physically available VMEM (64 MiB on v7x, 128 MiB on v5e/v6e).
    try:
        vmem_cap = int(pltpu.get_tpu_info().vmem_capacity_bytes)
    except Exception:                    # interpret mode / older runtimes
        vmem_cap = 64 << 20
    w_bytes = sum(int(p.size) * p.dtype.itemsize for p in params)
    act_bytes = Mt * 4 * C * 4                      # largest live f32 value (FFN hidden)
    io_bytes = 2 * 2 * Mt * max(C, 128) * 4         # double-buffered in/out (lane pad)
    vmem_limit = int(min(vmem_cap // 2,
                         max(16 << 20, 8 * act_bytes + io_bytes + w_bytes)))

    def _call(sdt):
        kernel = functools.partial(svga_block_kernel, H=H, W=W, C=C, K=K,
                                   roll_sign=roll_sign, approx_gelu=approx_gelu,
                                   shift_dtype=sdt)
        return pl.pallas_call(
            kernel,
            out_shape=jax.ShapeDtypeStruct((M, C), x.dtype),
            grid=(B // Bt,),
            in_specs=[pl.BlockSpec((Mt, C), lambda b: (b, 0))]
                     + [_full_spec(p) for p in params],
            out_specs=pl.BlockSpec((Mt, C), lambda b: (b, 0)),
            compiler_params=pltpu.CompilerParams(
                dimension_semantics=("parallel",),
                vmem_limit_bytes=vmem_limit),
        )(x2d, *params)

    try:
        out2d = _call(shift_dtype)
    except Exception:
        # bf16 sublane rotates may not lower on some generations/toolchains;
        # retry with the f32 shift loop rather than failing (eager call path).
        if np.dtype(shift_dtype) == np.dtype(np.float32):
            raise
        out2d = _call(jnp.float32)
    return out2d.reshape(B, H, W, C)


# ------------------------- parameter setup (plain JAX glue) ------------------ #

def fold_conv_bn(w, b, gamma, beta, mean, var, eps=1e-5):
    # w: (Cin, Cout) for the x @ w convention; BN over output channels.
    s = gamma / jnp.sqrt(var + eps)
    return w * s[None, :], (b - mean) * s + beta


def make_params(key, dim):
    ks = jax.random.split(key, 24)
    n = lambda k, shape, sc=0.1: sc * jax.random.normal(k, shape, jnp.float32)
    bn = lambda k1, k2, k3, k4, c: (1.0 + n(k1, (c,)), n(k2, (c,)), n(k3, (c,)),
                                    0.5 + jax.random.uniform(k4, (c,), jnp.float32))

    C, C2, C4 = dim, 2 * dim, 4 * dim
    # Grapher.fc1: Conv2d(C, C, 1) + BN(C)
    w1, b1 = n(ks[0], (C, C)), n(ks[1], (C,))
    w1, b1 = fold_conv_bn(w1, b1, *bn(ks[2], ks[3], ks[4], ks[5], C))
    # MRConv4d.nn: Conv2d(2C, 2C, 1) + BN(2C) + GELU
    wg, bg = n(ks[6], (C2, C2)), n(ks[7], (C2,))
    wg, bg = fold_conv_bn(wg, bg, *bn(ks[8], ks[9], ks[10], ks[11], C2))
    # Grapher.fc2: Conv2d(2C, C, 1) + BN(C)
    w2, b2 = n(ks[12], (C2, C)), n(ks[13], (C,))
    w2, b2 = fold_conv_bn(w2, b2, *bn(ks[14], ks[15], ks[16], ks[17], C))
    # FFN: Conv2d(C, 4C, 1), GELU, Conv2d(4C, C, 1)
    wf1, bf1 = n(ks[18], (C, C4)), n(ks[19], (C4,))
    wf2, bf2 = n(ks[20], (C4, C)), n(ks[21], (C,))

    # graph-conv weight split by input-channel group: rows 0:C act on y1 (the
    # "x" half of the torch concat), rows C:2C act on x_j (no in-kernel concat).
    wgx, wgj = wg[:C], wg[C:]

    # weights in bf16 (MXU-native operands); biases stay f32 as (1, Cout) rows
    wc = lambda w: w.astype(jnp.bfloat16)
    as2d = lambda v: v.reshape(1, -1)
    return (wc(w1), as2d(b1), wc(wgx), wc(wgj), as2d(bg), wc(w2), as2d(b2),
            wc(wf1), as2d(bf1), wc(wf2), as2d(bf2))


def reference(x, params, K, *, approx_gelu=False, shift_dtype=jnp.float32):
    """Pure-JAX NHWC reference emulating the kernel's bf16-operand / f32-acc
    matmuls and MRConv shift dtype.  With approx_gelu=False it uses the exact
    erf GELU of torch.nn.GELU()."""
    (w1, b1, wgx, wgj, bg, w2, b2, wf1, bf1, wf2, bf2) = params
    B, H, W, C = x.shape
    bf16 = jnp.bfloat16
    mm = lambda a, w: jnp.einsum('bhwc,cd->bhwd', a.astype(bf16), w,
                                 preferred_element_type=jnp.float32)

    y1 = mm(x, w1) + b1[0]
    ys = y1.astype(shift_dtype)
    x_j = jnp.zeros_like(ys)
    for i in range(K, H, K):
        x_j = jnp.maximum(x_j, ys - jnp.roll(ys, i, axis=1))
    for i in range(K, W, K):
        x_j = jnp.maximum(x_j, ys - jnp.roll(ys, i, axis=2))
    y2 = _gelu(mm(y1, wgx) + mm(x_j, wgj) + bg[0], approx_gelu)
    y3 = mm(y2, w2) + b2[0] + x
    h = _gelu(mm(y3, wf1) + bf1[0], approx_gelu)
    return mm(h, wf2) + bf2[0]


if __name__ == "__main__":
    B, C, Hs, Ws, K = 2, 32, 16, 16, 2     # dim=32, 16x16 spatial, k=2
    key = jax.random.PRNGKey(0)
    kx, kp = jax.random.split(key)
    x = jax.random.normal(kx, (B, Hs, Ws, C), jnp.float32)   # NHWC
    params = make_params(kp, C)

    shift_dtype = _default_shift_dtype()
    out = jax.block_until_ready(svga_block(x, params, K, shift_dtype=shift_dtype))

    # reference uses the exact (erf) GELU of the torch module; the kernel's
    # tanh GELU + bf16 matmul emulation stays well inside the tolerance.
    ref = jax.block_until_ready(
        reference(x, params, K, approx_gelu=False, shift_dtype=shift_dtype))

    max_diff = float(jnp.max(jnp.abs(out - ref)))
    assert out.shape == (B, Hs, Ws, C)
    assert max_diff < 2e-2, f"mismatch vs reference: {max_diff}"
    print("KERNEL_OK")
</pallas_src>

<mosaic_0001>
module attributes {stable_mosaic.version = 11 : i64} {
  func.func @probe(%arg0: memref<8x128xf32, #tpu.memory_space<vmem>>, %arg1: memref<8x128xf32, #tpu.memory_space<vmem>>) attributes {dimension_semantics = [], scalar_prefetch = 0 : i64, scratch_operands = 0 : i64, tpu.core_type = #tpu.core_type<tc>} {
    %c0 = arith.constant 0 : index
    %c0_0 = arith.constant 0 : index
    %0 = vector.load %arg0[%c0, %c0_0] : memref<8x128xf32, #tpu.memory_space<vmem>>, vector<8x128xf32>
    %c1_i32 = arith.constant 1 : i32
    %1 = tpu.dynamic_rotate %0 by %c1_i32 dim 0 : vector<8x128xf32>, i32 -> vector<8x128xf32>
    %c0_1 = arith.constant 0 : index
    %c0_2 = arith.constant 0 : index
    %2 = vector.load %arg1[%c0_1, %c0_2] : memref<8x128xf32, #tpu.memory_space<vmem>>, vector<8x128xf32>
    tpu.vector_store %arg1[%c0_1, %c0_2], %1 {strides = array<i32>} : memref<8x128xf32, #tpu.memory_space<vmem>>, vector<8x128xf32>,
    return
  }
}

</mosaic_0001>

<bundles_post_ra>
// kernel: tpu_custom_call.1
= control target key start
LH: loop header
LB: loop body
LE: loop exit
PB: predicated region body
PF: predicated region fallthrough
CT: control target
= control target key end

     0   :  { %6 = vsyncpa [#allocation3], 0  ;;  %s115_s0 = inlined_call_operand.hbm [shape: f32[8,128], index: 0, kind: input, shape index: {}]   ;;  %s116_s1 = inlined_call_operand.hbm [shape: f32[8,128], index: 1, kind: output, shape index: {}]  }
   0x1   :  { %7 = vsyncpa [#allocation4], 0  ;;  %s13_s8 = sshll.u32 %s115_s0, 4  ;;  %s97_s9 = smov [#allocation2]   ;;  %s14_s8 = int_to_ptr.hbm [resolvable:$true] %s13_s8 }
   0x2   :  { %s15_s10 = sshll.u32 %s97_s9, 4  ;;  %s16_s10 = int_to_ptr.vmem [resolvable:$true] %s15_s10 }
   0x3   :  { %18 = dma.hbm_to_vmem [thread:$0]  %s14_s8, 128, %s16_s10, [#allocation3]  }
   0x4   :  { %93 = dma.done.wait [#allocation3], 128  }
   0x5   :  { %94 = vsyncadd [#allocation3], 4294967168  ;;  %s98_s11 = smov [#allocation5]   ;;  %s33_s15 = sshll.u32 %s116_s1, 4  ;;  %v23_v0 = vld [vmem:[#allocation2] sm:$0xff]  ;;  %s34_s15 = int_to_ptr.hbm [resolvable:$true] %s33_s15 }
   0x6   :  { %s31_s12 = sshll.u32 %s98_s11, 4  ;;  %v24_v1 = vrot.slane %v23_v0, 7  ;;  %s32_s12 = int_to_ptr.vmem [resolvable:$true] %s31_s12 }
   0x8   :  { %25 = vst [vmem:[#allocation5] sm:$0xff] %v24_v1 }
   0x9   :  { %36 = dma.vmem_to_hbm [thread:$0]  %s32_s12, 128, %s34_s15, [#allocation4]  }
   0xa   :  { %95 = dma.done.wait [#allocation4], 128  }
   0xb   :  { %96 = vsyncadd [#allocation4], 4294967168 }
   0xc   :  { %41 = vsyncpa [#allocation3], 1 }
   0xd   :  { %42 = vsyncpa [#allocation4], 1 }

</bundles_post_ra>
